<compile_context>
chip_gen: v7x
topology: tpu7x:2x2x1
jax: 0.10.0
libtpu: 0.0.40
codegen_flags: <defaults>
</compile_context>

<pallas_src>
import jax
import jax.numpy as jnp
from jax import lax
from jax.experimental import pallas as pl
from jax.experimental.pallas import tpu as pltpu


def encoder_kernel(emb_ref, len_ref, wih_ref, whh_ref, bias_ref,
                   wout_ref, bout_ref, out_ref, xp_sc):
    """Full LSTM over T steps + fused (fc_mean | fc_log_var) epilogue."""
    B = out_ref.shape[0]
    TB, H4 = xp_sc.shape
    T = TB // B
    H = H4 // 4

    # ---- Phase 1: hoisted input projection (one big MXU matmul), bf16 scratch ----
    xp_sc[...] = jnp.dot(emb_ref[...], wih_ref[...],
                         preferred_element_type=jnp.float32).astype(jnp.bfloat16)

    # Hoisted out of the step body.
    last_t = len_ref[...] - 1                                     # (B, 1) int32
    bias = bias_ref[...]                                          # (1, 4H) f32

    # (1, 4H) lane masks, broadcast at use site (gate order i, f, g, o):
    # lanes [2H, 3H) are the tanh 'g' gate, the rest are sigmoid gates.
    lane = lax.broadcasted_iota(jnp.int32, (1, H4), 1)
    is_g = (lane >= 2 * H) & (lane < 3 * H)
    pre_scale = jnp.where(is_g, jnp.float32(1.0), jnp.float32(0.5))
    post_shift = jnp.where(is_g, jnp.float32(0.0), jnp.float32(0.5))

    # ---- Phase 2: recurrence, fully unrolled; h/c/hf live in vregs ----
    h = jnp.zeros((B, H), jnp.float32)
    c = jnp.zeros((B, H), jnp.float32)
    hf = jnp.zeros((B, H), jnp.float32)

    for t in range(T):
        gates = (xp_sc[pl.ds(t * B, B), :].astype(jnp.float32)
                 + bias
                 + jnp.dot(h.astype(jnp.bfloat16), whh_ref[...],
                           preferred_element_type=jnp.float32))   # (B, 4H) f32

        # sigmoid(i,f,o) and tanh(g) with a single EUP tanh pass:
        #   sigmoid(x) = 0.5 * (tanh(0.5*x) + 1)
        th = jnp.tanh(gates * pre_scale)
        acts = th * pre_scale + post_shift                        # (B, 4H)

        i_g = acts[:, 0:H]
        f_g = acts[:, H:2 * H]
        g_g = acts[:, 2 * H:3 * H]
        o_g = acts[:, 3 * H:4 * H]

        c = f_g * c + i_g * g_g
        h = o_g * jnp.tanh(c)

        # capture hidden state at t == length - 1 (== gather of last valid output)
        hf = jnp.where(last_t == t, h, hf)

    # ---- Epilogue: fused fc_mean | fc_log_var, lane-dense padded output ----
    # TODO(synk): h@W_hh in bf16 each step compounds rounding for long sequences;
    # fine at T=8 with 3e-2 tolerance, gate the cast for long-T / high-accuracy use.
    out_ref[...] = (jnp.dot(hf.astype(jnp.bfloat16), wout_ref[...],
                            preferred_element_type=jnp.float32)
                    + bout_ref[...])


def make_params(key, vocab, hidden, z_size, road_pad=0):
    ks = jax.random.split(key, 8)
    scale = 0.2
    emb = scale * jax.random.normal(ks[0], (vocab, hidden), jnp.float32)
    emb = emb.at[road_pad].set(0.0)                          # padding_idx=road_pad
    # PyTorch LSTM params: weight_ih (4H, H), weight_hh (4H, H), b_ih, b_hh (4H,)
    w_ih = scale * jax.random.normal(ks[1], (4 * hidden, hidden), jnp.float32)
    w_hh = scale * jax.random.normal(ks[2], (4 * hidden, hidden), jnp.float32)
    b_ih = scale * jax.random.normal(ks[3], (4 * hidden,), jnp.float32)
    b_hh = scale * jax.random.normal(ks[4], (4 * hidden,), jnp.float32)
    # fc_mean / fc_log_var: weight (Z, H), bias (Z,)
    w_mean = scale * jax.random.normal(ks[5], (z_size, hidden), jnp.float32)
    b_mean = scale * jax.random.normal(ks[6], (z_size,), jnp.float32)
    w_lvar = scale * jax.random.normal(ks[7], (z_size, hidden), jnp.float32)
    b_lvar = scale * jax.random.normal(jax.random.fold_in(key, 99),
                                       (z_size,), jnp.float32)
    return dict(embedding=emb, w_ih=w_ih, w_hh=w_hh, b_ih=b_ih, b_hh=b_hh,
                w_mean=w_mean, b_mean=b_mean, w_lvar=w_lvar, b_lvar=b_lvar)


@jax.jit
def encoder_forward(input_seqs, input_lengths, params):
    """Pallas-backed equivalent of Encoder.forward (batch > 1 packed branch)."""
    emb_table = params["embedding"]                          # (V, H)
    H = emb_table.shape[1]
    Z = params["w_mean"].shape[0]
    B, T = input_seqs.shape

    # pad batch up to a multiple of 8 sublanes
    B_pad = ((B + 7) // 8) * 8
    pad_b = B_pad - B
    seqs_p = jnp.pad(input_seqs.astype(jnp.int32), ((0, pad_b), (0, 0)))
    lens_p = jnp.pad(input_lengths.astype(jnp.int32), (0, pad_b),
                     constant_values=1)

    # time-major embedding gather (no (B,T,H) transpose materialization)
    # TODO(synk): at production T*B*H fuse this gather into the kernel
    # (scalar-prefetch token ids + pl.Element row gather) to drop the HBM round trip.
    emb_tm = emb_table[seqs_p.T]                             # (T, B_pad, H)
    emb2d = emb_tm.reshape(T * B_pad, H).astype(jnp.bfloat16)
    lens = lens_p.reshape(B_pad, 1)

    # stacked per-gate weights, pre-transposed for x @ W (gate order i, f, g, o)
    w_ih = params["w_ih"].T.astype(jnp.bfloat16)             # (H, 4H)
    w_hh = params["w_hh"].T.astype(jnp.bfloat16)             # (H, 4H)
    bias = (params["b_ih"] + params["b_hh"]).reshape(1, 4 * H).astype(jnp.float32)

    # fused fc_mean | fc_log_var weights, zero-padded to a 128-wide lane slab
    OUT = max(128, ((2 * Z + 127) // 128) * 128)
    w_out = jnp.zeros((H, OUT), jnp.float32)
    w_out = w_out.at[:, :Z].set(params["w_mean"].T)
    w_out = w_out.at[:, Z:2 * Z].set(params["w_lvar"].T)
    w_out = w_out.astype(jnp.bfloat16)
    b_out = jnp.zeros((1, OUT), jnp.float32)
    b_out = b_out.at[0, :Z].set(params["b_mean"])
    b_out = b_out.at[0, Z:2 * Z].set(params["b_lvar"])

    vmem = pl.BlockSpec(memory_space=pltpu.MemorySpace.VMEM)
    out = pl.pallas_call(
        encoder_kernel,
        out_shape=jax.ShapeDtypeStruct((B_pad, OUT), jnp.float32),
        in_specs=[vmem] * 7,
        out_specs=vmem,
        scratch_shapes=[pltpu.VMEM((T * B_pad, 4 * H), jnp.bfloat16)],  # x_proj
    )(emb2d, lens, w_ih, w_hh, bias, w_out, b_out)

    mean = out[:B, :Z]
    log_var = out[:B, Z:2 * Z]
    return mean, log_var


def encoder_reference(input_seqs, input_lengths, params):
    """Pure-JAX f32 reference mirroring the PyTorch forward semantics."""
    emb_table = params["embedding"]
    H = emb_table.shape[1]
    embedded = emb_table[input_seqs]                         # (B, T, H)
    B, T, _ = embedded.shape
    w_ih = params["w_ih"].reshape(4, H, H).transpose(0, 2, 1)
    w_hh = params["w_hh"].reshape(4, H, H).transpose(0, 2, 1)
    bias = (params["b_ih"] + params["b_hh"]).reshape(4, 1, H)

    def cell(carry, x_t):
        h, c = carry
        i = jax.nn.sigmoid(x_t @ w_ih[0] + h @ w_hh[0] + bias[0])
        f = jax.nn.sigmoid(x_t @ w_ih[1] + h @ w_hh[1] + bias[1])
        g = jnp.tanh(x_t @ w_ih[2] + h @ w_hh[2] + bias[2])
        o = jax.nn.sigmoid(x_t @ w_ih[3] + h @ w_hh[3] + bias[3])
        c_new = f * c + i * g
        h_new = o * jnp.tanh(c_new)
        return (h_new, c_new), h_new

    h0 = jnp.zeros((B, H), jnp.float32)
    c0 = jnp.zeros((B, H), jnp.float32)
    _, h_all = lax.scan(cell, (h0, c0), jnp.transpose(embedded, (1, 0, 2)))
    # gather last valid output per sequence (== pack/pad + gather in PyTorch)
    final = h_all[input_lengths - 1, jnp.arange(B)]          # (B, H)
    mean = final @ params["w_mean"].T + params["b_mean"]
    log_var = final @ params["w_lvar"].T + params["b_lvar"]
    return mean, log_var


if __name__ == "__main__":
    key = jax.random.PRNGKey(0)
    VOCAB, HIDDEN, Z = 32, 32, 16
    B, T = 4, 8
    ROAD_PAD = 0

    params = make_params(key, VOCAB, HIDDEN, Z, road_pad=ROAD_PAD)

    lengths = jnp.array([8, 5, 3, 6], dtype=jnp.int32)
    tok_key = jax.random.fold_in(key, 1)
    tokens = jax.random.randint(tok_key, (B, T), 1, VOCAB, dtype=jnp.int32)
    # zero-pad beyond each sequence's length (padding_idx token)
    t_idx = jnp.arange(T)[None, :]
    input_seqs = jnp.where(t_idx < lengths[:, None], tokens, ROAD_PAD)

    mean, log_var = encoder_forward(input_seqs, lengths, params)
    jax.block_until_ready((mean, log_var))

    ref_mean, ref_log_var = encoder_reference(input_seqs, lengths, params)
    assert mean.shape == (B, Z) and log_var.shape == (B, Z)
    # f32 reference vs bf16-MXU kernel: loose-but-meaningful tolerance.
    assert jnp.allclose(mean, ref_mean, rtol=3e-2, atol=3e-2), "mean mismatch"
    assert jnp.allclose(log_var, ref_log_var, rtol=3e-2, atol=3e-2), "log_var mismatch"

    print("KERNEL_OK")
</pallas_src>

<mosaic_0001>
module attributes {stable_mosaic.version = 11 : i64} {
  func.func @encoder_kernel(%arg0: memref<64x32xbf16, #tpu.memory_space<vmem>>, %arg1: memref<8x1xi32, #tpu.memory_space<vmem>>, %arg2: memref<32x128xbf16, #tpu.memory_space<vmem>>, %arg3: memref<32x128xbf16, #tpu.memory_space<vmem>>, %arg4: memref<1x128xf32, #tpu.memory_space<vmem>>, %arg5: memref<32x128xbf16, #tpu.memory_space<vmem>>, %arg6: memref<1x128xf32, #tpu.memory_space<vmem>>, %arg7: memref<8x128xf32, #tpu.memory_space<vmem>>, %arg8: memref<64x128xbf16, #tpu.memory_space<vmem>>) attributes {dimension_semantics = [], scalar_prefetch = 0 : i64, scratch_operands = 1 : i64, tpu.core_type = #tpu.core_type<tc>} {
    %c0 = arith.constant 0 : index
    %c0_0 = arith.constant 0 : index
    %0 = vector.load %arg0[%c0, %c0_0] : memref<64x32xbf16, #tpu.memory_space<vmem>>, vector<64x32xbf16>
    %c0_1 = arith.constant 0 : index
    %c0_2 = arith.constant 0 : index
    %1 = vector.load %arg2[%c0_1, %c0_2] : memref<32x128xbf16, #tpu.memory_space<vmem>>, vector<32x128xbf16>
    %cst = arith.constant dense<0.000000e+00> : vector<64x128xf32>
    %2 = tpu.matmul %0, %1, %cst {dimension_numbers = #tpu.dot_dimension_numbers<[1], [0], [0], [1], [0, 0, 1, 1], [], []>} : vector<64x32xbf16>, vector<32x128xbf16>, vector<64x128xf32> -> vector<64x128xf32>
    %3 = arith.truncf %2 : vector<64x128xf32> to vector<64x128xbf16>
    %c0_3 = arith.constant 0 : index
    %c0_4 = arith.constant 0 : index
    %4 = vector.load %arg8[%c0_3, %c0_4] : memref<64x128xbf16, #tpu.memory_space<vmem>>, vector<64x128xbf16>
    tpu.vector_store %arg8[%c0_3, %c0_4], %3 {strides = array<i32>} : memref<64x128xbf16, #tpu.memory_space<vmem>>, vector<64x128xbf16>,
    %c0_5 = arith.constant 0 : index
    %c0_6 = arith.constant 0 : index
    %5 = vector.load %arg1[%c0_5, %c0_6] : memref<8x1xi32, #tpu.memory_space<vmem>>, vector<8x1xi32>
    %c1_i32 = arith.constant 1 : i32
    %6 = vector.broadcast %c1_i32 : i32 to vector<8x1xi32>
    %7 = arith.subi %5, %6 : vector<8x1xi32>
    %c0_7 = arith.constant 0 : index
    %c0_8 = arith.constant 0 : index
    %8 = vector.load %arg4[%c0_7, %c0_8] : memref<1x128xf32, #tpu.memory_space<vmem>>, vector<1x128xf32>
    %9 = tpu.iota {dimensions = array<i32: 1>} : vector<1x128xi32>
    %c64_i32 = arith.constant 64 : i32
    %10 = vector.broadcast %c64_i32 : i32 to vector<1x128xi32>
    %11 = arith.cmpi sge, %9, %10 : vector<1x128xi32>
    %c96_i32 = arith.constant 96 : i32
    %12 = vector.broadcast %c96_i32 : i32 to vector<1x128xi32>
    %13 = arith.cmpi slt, %9, %12 : vector<1x128xi32>
    %14 = arith.andi %11, %13 : vector<1x128xi1>
    %cst_9 = arith.constant 1.000000e+00 : f32
    %cst_10 = arith.constant 5.000000e-01 : f32
    %15 = vector.broadcast %cst_9 : f32 to vector<1x128xf32>
    %16 = vector.broadcast %cst_10 : f32 to vector<1x128xf32>
    %17 = arith.select %14, %15, %16 : vector<1x128xi1>, vector<1x128xf32>
    %cst_11 = arith.constant 0.000000e+00 : f32
    %cst_12 = arith.constant 5.000000e-01 : f32
    %18 = vector.broadcast %cst_11 : f32 to vector<1x128xf32>
    %19 = vector.broadcast %cst_12 : f32 to vector<1x128xf32>
    %20 = arith.select %14, %18, %19 : vector<1x128xi1>, vector<1x128xf32>
    %cst_13 = arith.constant 0.000000e+00 : f32
    %21 = vector.broadcast %cst_13 : f32 to vector<8x32xf32>
    %cst_14 = arith.constant 0.000000e+00 : f32
    %22 = vector.broadcast %cst_14 : f32 to vector<8x32xf32>
    %cst_15 = arith.constant 0.000000e+00 : f32
    %23 = vector.broadcast %cst_15 : f32 to vector<8x32xf32>
    %c0_16 = arith.constant 0 : index
    %c0_17 = arith.constant 0 : index
    %24 = vector.load %arg8[%c0_16, %c0_17] : memref<64x128xbf16, #tpu.memory_space<vmem>>, vector<8x128xbf16>
    %25 = arith.extf %24 : vector<8x128xbf16> to vector<8x128xf32>
    %26 = vector.broadcast %8 : vector<1x128xf32> to vector<8x128xf32>
    %27 = arith.addf %25, %26 : vector<8x128xf32>
    %28 = arith.truncf %21 : vector<8x32xf32> to vector<8x32xbf16>
    %c0_18 = arith.constant 0 : index
    %c0_19 = arith.constant 0 : index
    %29 = vector.load %arg3[%c0_18, %c0_19] : memref<32x128xbf16, #tpu.memory_space<vmem>>, vector<32x128xbf16>
    %cst_20 = arith.constant dense<0.000000e+00> : vector<8x128xf32>
    %30 = tpu.matmul %28, %29, %cst_20 {dimension_numbers = #tpu.dot_dimension_numbers<[1], [0], [0], [1], [0, 0, 1, 1], [], []>} : vector<8x32xbf16>, vector<32x128xbf16>, vector<8x128xf32> -> vector<8x128xf32>
    %31 = arith.addf %27, %30 : vector<8x128xf32>
    %32 = vector.broadcast %17 : vector<1x128xf32> to vector<8x128xf32>
    %33 = arith.mulf %31, %32 : vector<8x128xf32>
    %34 = math.tanh %33 : vector<8x128xf32>
    %35 = vector.broadcast %17 : vector<1x128xf32> to vector<8x128xf32>
    %36 = arith.mulf %34, %35 : vector<8x128xf32>
    %37 = vector.broadcast %20 : vector<1x128xf32> to vector<8x128xf32>
    %38 = arith.addf %36, %37 : vector<8x128xf32>
    %39 = vector.extract_strided_slice %38 {offsets = [0, 0], sizes = [8, 32], strides = [1, 1]} : vector<8x128xf32> to vector<8x32xf32>
    %40 = vector.extract_strided_slice %38 {offsets = [0, 32], sizes = [8, 32], strides = [1, 1]} : vector<8x128xf32> to vector<8x32xf32>
    %41 = vector.extract_strided_slice %38 {offsets = [0, 64], sizes = [8, 32], strides = [1, 1]} : vector<8x128xf32> to vector<8x32xf32>
    %42 = vector.extract_strided_slice %38 {offsets = [0, 96], sizes = [8, 32], strides = [1, 1]} : vector<8x128xf32> to vector<8x32xf32>
    %43 = arith.mulf %40, %22 : vector<8x32xf32>
    %44 = arith.mulf %39, %41 : vector<8x32xf32>
    %45 = arith.addf %43, %44 : vector<8x32xf32>
    %46 = math.tanh %45 : vector<8x32xf32>
    %47 = arith.mulf %42, %46 : vector<8x32xf32>
    %c0_i32 = arith.constant 0 : i32
    %48 = vector.broadcast %c0_i32 : i32 to vector<8x1xi32>
    %49 = arith.cmpi eq, %7, %48 : vector<8x1xi32>
    %50 = vector.shape_cast %49 : vector<8x1xi1> to vector<8x1xi1>
    %51 = vector.broadcast %50 : vector<8x1xi1> to vector<8x32xi1>
    %52 = arith.select %51, %47, %23 : vector<8x32xi1>, vector<8x32xf32>
    %c8 = arith.constant 8 : index
    %c0_21 = arith.constant 0 : index
    %53 = vector.load %arg8[%c8, %c0_21] : memref<64x128xbf16, #tpu.memory_space<vmem>>, vector<8x128xbf16>
    %54 = arith.extf %53 : vector<8x128xbf16> to vector<8x128xf32>
    %55 = vector.broadcast %8 : vector<1x128xf32> to vector<8x128xf32>
    %56 = arith.addf %54, %55 : vector<8x128xf32>
    %57 = arith.truncf %47 : vector<8x32xf32> to vector<8x32xbf16>
    %c0_22 = arith.constant 0 : index
    %c0_23 = arith.constant 0 : index
    %58 = vector.load %arg3[%c0_22, %c0_23] : memref<32x128xbf16, #tpu.memory_space<vmem>>, vector<32x128xbf16>
    %cst_24 = arith.constant dense<0.000000e+00> : vector<8x128xf32>
    %59 = tpu.matmul %57, %58, %cst_24 {dimension_numbers = #tpu.dot_dimension_numbers<[1], [0], [0], [1], [0, 0, 1, 1], [], []>} : vector<8x32xbf16>, vector<32x128xbf16>, vector<8x128xf32> -> vector<8x128xf32>
    %60 = arith.addf %56, %59 : vector<8x128xf32>
    %61 = vector.broadcast %17 : vector<1x128xf32> to vector<8x128xf32>
    %62 = arith.mulf %60, %61 : vector<8x128xf32>
    %63 = math.tanh %62 : vector<8x128xf32>
    %64 = vector.broadcast %17 : vector<1x128xf32> to vector<8x128xf32>
    %65 = arith.mulf %63, %64 : vector<8x128xf32>
    %66 = vector.broadcast %20 : vector<1x128xf32> to vector<8x128xf32>
    %67 = arith.addf %65, %66 : vector<8x128xf32>
    %68 = vector.extract_strided_slice %67 {offsets = [0, 0], sizes = [8, 32], strides = [1, 1]} : vector<8x128xf32> to vector<8x32xf32>
    %69 = vector.extract_strided_slice %67 {offsets = [0, 32], sizes = [8, 32], strides = [1, 1]} : vector<8x128xf32> to vector<8x32xf32>
    %70 = vector.extract_strided_slice %67 {offsets = [0, 64], sizes = [8, 32], strides = [1, 1]} : vector<8x128xf32> to vector<8x32xf32>
    %71 = vector.extract_strided_slice %67 {offsets = [0, 96], sizes = [8, 32], strides = [1, 1]} : vector<8x128xf32> to vector<8x32xf32>
    %72 = arith.mulf %69, %45 : vector<8x32xf32>
    %73 = arith.mulf %68, %70 : vector<8x32xf32>
    %74 = arith.addf %72, %73 : vector<8x32xf32>
    %75 = math.tanh %74 : vector<8x32xf32>
    %76 = arith.mulf %71, %75 : vector<8x32xf32>
    %c1_i32_25 = arith.constant 1 : i32
    %77 = vector.broadcast %c1_i32_25 : i32 to vector<8x1xi32>
    %78 = arith.cmpi eq, %7, %77 : vector<8x1xi32>
    %79 = vector.shape_cast %78 : vector<8x1xi1> to vector<8x1xi1>
    %80 = vector.broadcast %79 : vector<8x1xi1> to vector<8x32xi1>
    %81 = arith.select %80, %76, %52 : vector<8x32xi1>, vector<8x32xf32>
    %c16 = arith.constant 16 : index
    %c0_26 = arith.constant 0 : index
    %82 = vector.load %arg8[%c16, %c0_26] : memref<64x128xbf16, #tpu.memory_space<vmem>>, vector<8x128xbf16>
    %83 = arith.extf %82 : vector<8x128xbf16> to vector<8x128xf32>
    %84 = vector.broadcast %8 : vector<1x128xf32> to vector<8x128xf32>
    %85 = arith.addf %83, %84 : vector<8x128xf32>
    %86 = arith.truncf %76 : vector<8x32xf32> to vector<8x32xbf16>
    %c0_27 = arith.constant 0 : index
    %c0_28 = arith.constant 0 : index
    %87 = vector.load %arg3[%c0_27, %c0_28] : memref<32x128xbf16, #tpu.memory_space<vmem>>, vector<32x128xbf16>
    %cst_29 = arith.constant dense<0.000000e+00> : vector<8x128xf32>
    %88 = tpu.matmul %86, %87, %cst_29 {dimension_numbers = #tpu.dot_dimension_numbers<[1], [0], [0], [1], [0, 0, 1, 1], [], []>} : vector<8x32xbf16>, vector<32x128xbf16>, vector<8x128xf32> -> vector<8x128xf32>
    %89 = arith.addf %85, %88 : vector<8x128xf32>
    %90 = vector.broadcast %17 : vector<1x128xf32> to vector<8x128xf32>
    %91 = arith.mulf %89, %90 : vector<8x128xf32>
    %92 = math.tanh %91 : vector<8x128xf32>
    %93 = vector.broadcast %17 : vector<1x128xf32> to vector<8x128xf32>
    %94 = arith.mulf %92, %93 : vector<8x128xf32>
    %95 = vector.broadcast %20 : vector<1x128xf32> to vector<8x128xf32>
    %96 = arith.addf %94, %95 : vector<8x128xf32>
    %97 = vector.extract_strided_slice %96 {offsets = [0, 0], sizes = [8, 32], strides = [1, 1]} : vector<8x128xf32> to vector<8x32xf32>
    %98 = vector.extract_strided_slice %96 {offsets = [0, 32], sizes = [8, 32], strides = [1, 1]} : vector<8x128xf32> to vector<8x32xf32>
    %99 = vector.extract_strided_slice %96 {offsets = [0, 64], sizes = [8, 32], strides = [1, 1]} : vector<8x128xf32> to vector<8x32xf32>
    %100 = vector.extract_strided_slice %96 {offsets = [0, 96], sizes = [8, 32], strides = [1, 1]} : vector<8x128xf32> to vector<8x32xf32>
    %101 = arith.mulf %98, %74 : vector<8x32xf32>
    %102 = arith.mulf %97, %99 : vector<8x32xf32>
    %103 = arith.addf %101, %102 : vector<8x32xf32>
    %104 = math.tanh %103 : vector<8x32xf32>
    %105 = arith.mulf %100, %104 : vector<8x32xf32>
    %c2_i32 = arith.constant 2 : i32
    %106 = vector.broadcast %c2_i32 : i32 to vector<8x1xi32>
    %107 = arith.cmpi eq, %7, %106 : vector<8x1xi32>
    %108 = vector.shape_cast %107 : vector<8x1xi1> to vector<8x1xi1>
    %109 = vector.broadcast %108 : vector<8x1xi1> to vector<8x32xi1>
    %110 = arith.select %109, %105, %81 : vector<8x32xi1>, vector<8x32xf32>
    %c24 = arith.constant 24 : index
    %c0_30 = arith.constant 0 : index
    %111 = vector.load %arg8[%c24, %c0_30] : memref<64x128xbf16, #tpu.memory_space<vmem>>, vector<8x128xbf16>
    %112 = arith.extf %111 : vector<8x128xbf16> to vector<8x128xf32>
    %113 = vector.broadcast %8 : vector<1x128xf32> to vector<8x128xf32>
    %114 = arith.addf %112, %113 : vector<8x128xf32>
    %115 = arith.truncf %105 : vector<8x32xf32> to vector<8x32xbf16>
    %c0_31 = arith.constant 0 : index
    %c0_32 = arith.constant 0 : index
    %116 = vector.load %arg3[%c0_31, %c0_32] : memref<32x128xbf16, #tpu.memory_space<vmem>>, vector<32x128xbf16>
    %cst_33 = arith.constant dense<0.000000e+00> : vector<8x128xf32>
    %117 = tpu.matmul %115, %116, %cst_33 {dimension_numbers = #tpu.dot_dimension_numbers<[1], [0], [0], [1], [0, 0, 1, 1], [], []>} : vector<8x32xbf16>, vector<32x128xbf16>, vector<8x128xf32> -> vector<8x128xf32>
    %118 = arith.addf %114, %117 : vector<8x128xf32>
    %119 = vector.broadcast %17 : vector<1x128xf32> to vector<8x128xf32>
    %120 = arith.mulf %118, %119 : vector<8x128xf32>
    %121 = math.tanh %120 : vector<8x128xf32>
    %122 = vector.broadcast %17 : vector<1x128xf32> to vector<8x128xf32>
    %123 = arith.mulf %121, %122 : vector<8x128xf32>
    %124 = vector.broadcast %20 : vector<1x128xf32> to vector<8x128xf32>
    %125 = arith.addf %123, %124 : vector<8x128xf32>
    %126 = vector.extract_strided_slice %125 {offsets = [0, 0], sizes = [8, 32], strides = [1, 1]} : vector<8x128xf32> to vector<8x32xf32>
    %127 = vector.extract_strided_slice %125 {offsets = [0, 32], sizes = [8, 32], strides = [1, 1]} : vector<8x128xf32> to vector<8x32xf32>
    %128 = vector.extract_strided_slice %125 {offsets = [0, 64], sizes = [8, 32], strides = [1, 1]} : vector<8x128xf32> to vector<8x32xf32>
    %129 = vector.extract_strided_slice %125 {offsets = [0, 96], sizes = [8, 32], strides = [1, 1]} : vector<8x128xf32> to vector<8x32xf32>
    %130 = arith.mulf %127, %103 : vector<8x32xf32>
    %131 = arith.mulf %126, %128 : vector<8x32xf32>
    %132 = arith.addf %130, %131 : vector<8x32xf32>
    %133 = math.tanh %132 : vector<8x32xf32>
    %134 = arith.mulf %129, %133 : vector<8x32xf32>
    %c3_i32 = arith.constant 3 : i32
    %135 = vector.broadcast %c3_i32 : i32 to vector<8x1xi32>
    %136 = arith.cmpi eq, %7, %135 : vector<8x1xi32>
    %137 = vector.shape_cast %136 : vector<8x1xi1> to vector<8x1xi1>
    %138 = vector.broadcast %137 : vector<8x1xi1> to vector<8x32xi1>
    %139 = arith.select %138, %134, %110 : vector<8x32xi1>, vector<8x32xf32>
    %c32 = arith.constant 32 : index
    %c0_34 = arith.constant 0 : index
    %140 = vector.load %arg8[%c32, %c0_34] : memref<64x128xbf16, #tpu.memory_space<vmem>>, vector<8x128xbf16>
    %141 = arith.extf %140 : vector<8x128xbf16> to vector<8x128xf32>
    %142 = vector.broadcast %8 : vector<1x128xf32> to vector<8x128xf32>
    %143 = arith.addf %141, %142 : vector<8x128xf32>
    %144 = arith.truncf %134 : vector<8x32xf32> to vector<8x32xbf16>
    %c0_35 = arith.constant 0 : index
    %c0_36 = arith.constant 0 : index
    %145 = vector.load %arg3[%c0_35, %c0_36] : memref<32x128xbf16, #tpu.memory_space<vmem>>, vector<32x128xbf16>
    %cst_37 = arith.constant dense<0.000000e+00> : vector<8x128xf32>
    %146 = tpu.matmul %144, %145, %cst_37 {dimension_numbers = #tpu.dot_dimension_numbers<[1], [0], [0], [1], [0, 0, 1, 1], [], []>} : vector<8x32xbf16>, vector<32x128xbf16>, vector<8x128xf32> -> vector<8x128xf32>
    %147 = arith.addf %143, %146 : vector<8x128xf32>
    %148 = vector.broadcast %17 : vector<1x128xf32> to vector<8x128xf32>
    %149 = arith.mulf %147, %148 : vector<8x128xf32>
    %150 = math.tanh %149 : vector<8x128xf32>
    %151 = vector.broadcast %17 : vector<1x128xf32> to vector<8x128xf32>
    %152 = arith.mulf %150, %151 : vector<8x128xf32>
    %153 = vector.broadcast %20 : vector<1x128xf32> to vector<8x128xf32>
    %154 = arith.addf %152, %153 : vector<8x128xf32>
    %155 = vector.extract_strided_slice %154 {offsets = [0, 0], sizes = [8, 32], strides = [1, 1]} : vector<8x128xf32> to vector<8x32xf32>
    %156 = vector.extract_strided_slice %154 {offsets = [0, 32], sizes = [8, 32], strides = [1, 1]} : vector<8x128xf32> to vector<8x32xf32>
    %157 = vector.extract_strided_slice %154 {offsets = [0, 64], sizes = [8, 32], strides = [1, 1]} : vector<8x128xf32> to vector<8x32xf32>
    %158 = vector.extract_strided_slice %154 {offsets = [0, 96], sizes = [8, 32], strides = [1, 1]} : vector<8x128xf32> to vector<8x32xf32>
    %159 = arith.mulf %156, %132 : vector<8x32xf32>
    %160 = arith.mulf %155, %157 : vector<8x32xf32>
    %161 = arith.addf %159, %160 : vector<8x32xf32>
    %162 = math.tanh %161 : vector<8x32xf32>
    %163 = arith.mulf %158, %162 : vector<8x32xf32>
    %c4_i32 = arith.constant 4 : i32
    %164 = vector.broadcast %c4_i32 : i32 to vector<8x1xi32>
    %165 = arith.cmpi eq, %7, %164 : vector<8x1xi32>
    %166 = vector.shape_cast %165 : vector<8x1xi1> to vector<8x1xi1>
    %167 = vector.broadcast %166 : vector<8x1xi1> to vector<8x32xi1>
    %168 = arith.select %167, %163, %139 : vector<8x32xi1>, vector<8x32xf32>
    %c40 = arith.constant 40 : index
    %c0_38 = arith.constant 0 : index
    %169 = vector.load %arg8[%c40, %c0_38] : memref<64x128xbf16, #tpu.memory_space<vmem>>, vector<8x128xbf16>
    %170 = arith.extf %169 : vector<8x128xbf16> to vector<8x128xf32>
    %171 = vector.broadcast %8 : vector<1x128xf32> to vector<8x128xf32>
    %172 = arith.addf %170, %171 : vector<8x128xf32>
    %173 = arith.truncf %163 : vector<8x32xf32> to vector<8x32xbf16>
    %c0_39 = arith.constant 0 : index
    %c0_40 = arith.constant 0 : index
    %174 = vector.load %arg3[%c0_39, %c0_40] : memref<32x128xbf16, #tpu.memory_space<vmem>>, vector<32x128xbf16>
    %cst_41 = arith.constant dense<0.000000e+00> : vector<8x128xf32>
    %175 = tpu.matmul %173, %174, %cst_41 {dimension_numbers = #tpu.dot_dimension_numbers<[1], [0], [0], [1], [0, 0, 1, 1], [], []>} : vector<8x32xbf16>, vector<32x128xbf16>, vector<8x128xf32> -> vector<8x128xf32>
    %176 = arith.addf %172, %175 : vector<8x128xf32>
    %177 = vector.broadcast %17 : vector<1x128xf32> to vector<8x128xf32>
    %178 = arith.mulf %176, %177 : vector<8x128xf32>
    %179 = math.tanh %178 : vector<8x128xf32>
    %180 = vector.broadcast %17 : vector<1x128xf32> to vector<8x128xf32>
    %181 = arith.mulf %179, %180 : vector<8x128xf32>
    %182 = vector.broadcast %20 : vector<1x128xf32> to vector<8x128xf32>
    %183 = arith.addf %181, %182 : vector<8x128xf32>
    %184 = vector.extract_strided_slice %183 {offsets = [0, 0], sizes = [8, 32], strides = [1, 1]} : vector<8x128xf32> to vector<8x32xf32>
    %185 = vector.extract_strided_slice %183 {offsets = [0, 32], sizes = [8, 32], strides = [1, 1]} : vector<8x128xf32> to vector<8x32xf32>
    %186 = vector.extract_strided_slice %183 {offsets = [0, 64], sizes = [8, 32], strides = [1, 1]} : vector<8x128xf32> to vector<8x32xf32>
    %187 = vector.extract_strided_slice %183 {offsets = [0, 96], sizes = [8, 32], strides = [1, 1]} : vector<8x128xf32> to vector<8x32xf32>
    %188 = arith.mulf %185, %161 : vector<8x32xf32>
    %189 = arith.mulf %184, %186 : vector<8x32xf32>
    %190 = arith.addf %188, %189 : vector<8x32xf32>
    %191 = math.tanh %190 : vector<8x32xf32>
    %192 = arith.mulf %187, %191 : vector<8x32xf32>
    %c5_i32 = arith.constant 5 : i32
    %193 = vector.broadcast %c5_i32 : i32 to vector<8x1xi32>
    %194 = arith.cmpi eq, %7, %193 : vector<8x1xi32>
    %195 = vector.shape_cast %194 : vector<8x1xi1> to vector<8x1xi1>
    %196 = vector.broadcast %195 : vector<8x1xi1> to vector<8x32xi1>
    %197 = arith.select %196, %192, %168 : vector<8x32xi1>, vector<8x32xf32>
    %c48 = arith.constant 48 : index
    %c0_42 = arith.constant 0 : index
    %198 = vector.load %arg8[%c48, %c0_42] : memref<64x128xbf16, #tpu.memory_space<vmem>>, vector<8x128xbf16>
    %199 = arith.extf %198 : vector<8x128xbf16> to vector<8x128xf32>
    %200 = vector.broadcast %8 : vector<1x128xf32> to vector<8x128xf32>
    %201 = arith.addf %199, %200 : vector<8x128xf32>
    %202 = arith.truncf %192 : vector<8x32xf32> to vector<8x32xbf16>
    %c0_43 = arith.constant 0 : index
    %c0_44 = arith.constant 0 : index
    %203 = vector.load %arg3[%c0_43, %c0_44] : memref<32x128xbf16, #tpu.memory_space<vmem>>, vector<32x128xbf16>
    %cst_45 = arith.constant dense<0.000000e+00> : vector<8x128xf32>
    %204 = tpu.matmul %202, %203, %cst_45 {dimension_numbers = #tpu.dot_dimension_numbers<[1], [0], [0], [1], [0, 0, 1, 1], [], []>} : vector<8x32xbf16>, vector<32x128xbf16>, vector<8x128xf32> -> vector<8x128xf32>
    %205 = arith.addf %201, %204 : vector<8x128xf32>
    %206 = vector.broadcast %17 : vector<1x128xf32> to vector<8x128xf32>
    %207 = arith.mulf %205, %206 : vector<8x128xf32>
    %208 = math.tanh %207 : vector<8x128xf32>
    %209 = vector.broadcast %17 : vector<1x128xf32> to vector<8x128xf32>
    %210 = arith.mulf %208, %209 : vector<8x128xf32>
    %211 = vector.broadcast %20 : vector<1x128xf32> to vector<8x128xf32>
    %212 = arith.addf %210, %211 : vector<8x128xf32>
    %213 = vector.extract_strided_slice %212 {offsets = [0, 0], sizes = [8, 32], strides = [1, 1]} : vector<8x128xf32> to vector<8x32xf32>
    %214 = vector.extract_strided_slice %212 {offsets = [0, 32], sizes = [8, 32], strides = [1, 1]} : vector<8x128xf32> to vector<8x32xf32>
    %215 = vector.extract_strided_slice %212 {offsets = [0, 64], sizes = [8, 32], strides = [1, 1]} : vector<8x128xf32> to vector<8x32xf32>
    %216 = vector.extract_strided_slice %212 {offsets = [0, 96], sizes = [8, 32], strides = [1, 1]} : vector<8x128xf32> to vector<8x32xf32>
    %217 = arith.mulf %214, %190 : vector<8x32xf32>
    %218 = arith.mulf %213, %215 : vector<8x32xf32>
    %219 = arith.addf %217, %218 : vector<8x32xf32>
    %220 = math.tanh %219 : vector<8x32xf32>
    %221 = arith.mulf %216, %220 : vector<8x32xf32>
    %c6_i32 = arith.constant 6 : i32
    %222 = vector.broadcast %c6_i32 : i32 to vector<8x1xi32>
    %223 = arith.cmpi eq, %7, %222 : vector<8x1xi32>
    %224 = vector.shape_cast %223 : vector<8x1xi1> to vector<8x1xi1>
    %225 = vector.broadcast %224 : vector<8x1xi1> to vector<8x32xi1>
    %226 = arith.select %225, %221, %197 : vector<8x32xi1>, vector<8x32xf32>
    %c56 = arith.constant 56 : index
    %c0_46 = arith.constant 0 : index
    %227 = vector.load %arg8[%c56, %c0_46] : memref<64x128xbf16, #tpu.memory_space<vmem>>, vector<8x128xbf16>
    %228 = arith.extf %227 : vector<8x128xbf16> to vector<8x128xf32>
    %229 = vector.broadcast %8 : vector<1x128xf32> to vector<8x128xf32>
    %230 = arith.addf %228, %229 : vector<8x128xf32>
    %231 = arith.truncf %221 : vector<8x32xf32> to vector<8x32xbf16>
    %c0_47 = arith.constant 0 : index
    %c0_48 = arith.constant 0 : index
    %232 = vector.load %arg3[%c0_47, %c0_48] : memref<32x128xbf16, #tpu.memory_space<vmem>>, vector<32x128xbf16>
    %cst_49 = arith.constant dense<0.000000e+00> : vector<8x128xf32>
    %233 = tpu.matmul %231, %232, %cst_49 {dimension_numbers = #tpu.dot_dimension_numbers<[1], [0], [0], [1], [0, 0, 1, 1], [], []>} : vector<8x32xbf16>, vector<32x128xbf16>, vector<8x128xf32> -> vector<8x128xf32>
    %234 = arith.addf %230, %233 : vector<8x128xf32>
    %235 = vector.broadcast %17 : vector<1x128xf32> to vector<8x128xf32>
    %236 = arith.mulf %234, %235 : vector<8x128xf32>
    %237 = math.tanh %236 : vector<8x128xf32>
    %238 = vector.broadcast %17 : vector<1x128xf32> to vector<8x128xf32>
    %239 = arith.mulf %237, %238 : vector<8x128xf32>
    %240 = vector.broadcast %20 : vector<1x128xf32> to vector<8x128xf32>
    %241 = arith.addf %239, %240 : vector<8x128xf32>
    %242 = vector.extract_strided_slice %241 {offsets = [0, 0], sizes = [8, 32], strides = [1, 1]} : vector<8x128xf32> to vector<8x32xf32>
    %243 = vector.extract_strided_slice %241 {offsets = [0, 32], sizes = [8, 32], strides = [1, 1]} : vector<8x128xf32> to vector<8x32xf32>
    %244 = vector.extract_strided_slice %241 {offsets = [0, 64], sizes = [8, 32], strides = [1, 1]} : vector<8x128xf32> to vector<8x32xf32>
    %245 = vector.extract_strided_slice %241 {offsets = [0, 96], sizes = [8, 32], strides = [1, 1]} : vector<8x128xf32> to vector<8x32xf32>
    %246 = arith.mulf %243, %219 : vector<8x32xf32>
    %247 = arith.mulf %242, %244 : vector<8x32xf32>
    %248 = arith.addf %246, %247 : vector<8x32xf32>
    %249 = math.tanh %248 : vector<8x32xf32>
    %250 = arith.mulf %245, %249 : vector<8x32xf32>
    %c7_i32 = arith.constant 7 : i32
    %251 = vector.broadcast %c7_i32 : i32 to vector<8x1xi32>
    %252 = arith.cmpi eq, %7, %251 : vector<8x1xi32>
    %253 = vector.shape_cast %252 : vector<8x1xi1> to vector<8x1xi1>
    %254 = vector.broadcast %253 : vector<8x1xi1> to vector<8x32xi1>
    %255 = arith.select %254, %250, %226 : vector<8x32xi1>, vector<8x32xf32>
    %256 = arith.truncf %255 : vector<8x32xf32> to vector<8x32xbf16>
    %c0_50 = arith.constant 0 : index
    %c0_51 = arith.constant 0 : index
    %257 = vector.load %arg5[%c0_50, %c0_51] : memref<32x128xbf16, #tpu.memory_space<vmem>>, vector<32x128xbf16>
    %cst_52 = arith.constant dense<0.000000e+00> : vector<8x128xf32>
    %258 = tpu.matmul %256, %257, %cst_52 {dimension_numbers = #tpu.dot_dimension_numbers<[1], [0], [0], [1], [0, 0, 1, 1], [], []>} : vector<8x32xbf16>, vector<32x128xbf16>, vector<8x128xf32> -> vector<8x128xf32>
    %c0_53 = arith.constant 0 : index
    %c0_54 = arith.constant 0 : index
    %259 = vector.load %arg6[%c0_53, %c0_54] : memref<1x128xf32, #tpu.memory_space<vmem>>, vector<1x128xf32>
    %260 = vector.broadcast %259 : vector<1x128xf32> to vector<8x128xf32>
    %261 = arith.addf %258, %260 : vector<8x128xf32>
    %c0_55 = arith.constant 0 : index
    %c0_56 = arith.constant 0 : index
    %262 = vector.load %arg7[%c0_55, %c0_56] : memref<8x128xf32, #tpu.memory_space<vmem>>, vector<8x128xf32>
    tpu.vector_store %arg7[%c0_55, %c0_56], %261 {strides = array<i32>} : memref<8x128xf32, #tpu.memory_space<vmem>>, vector<8x128xf32>,
    return
  }
}

</mosaic_0001>

<bundles_post_ra>
// kernel: encoder_forward.1
= control target key start
LH: loop header
LB: loop body
LE: loop exit
PB: predicated region body
PF: predicated region fallthrough
CT: control target
= control target key end

     0   :  { %v1096_v1 = vmov 0.0   ;;  %vm1097_vm0 = vmmov 0   ;;  %vm71_vm1 = vcmask 261120   ;;  %v1098_v3 = vmov 0   ;;  %s1101_s13 = smov 32   ;;  %s1382_s2 = inlined_call_operand.vmem [shape: bf16[32,128], index: 2, kind: input, shape index: {}]   ;;  %s1383_s0 = inlined_call_operand.vmem [shape: bf16[64,32], index: 0, kind: input, shape index: {}]   ;;  %s1384_s3 = inlined_call_operand.vmem [shape: bf16[32,128], index: 3, kind: input, shape index: {}]   ;;  %s1385_s4 = inlined_call_operand.vmem [shape: f32[1,128], index: 4, kind: input, shape index: {}]   ;;  %s1386_s1 = inlined_call_operand.vmem [shape: s32[8,1], index: 1, kind: input, shape index: {}]   ;;  %s1387_s5 = inlined_call_operand.vmem [shape: bf16[32,128], index: 5, kind: input, shape index: {}]   ;;  %s1388_s6 = inlined_call_operand.vmem [shape: f32[1,128], index: 6, kind: input, shape index: {}]   ;;  %s1389_s7 = inlined_call_operand.vmem [shape: f32[8,128], index: 7, kind: output, shape index: {}]  }
   0x1   :  { %v1054_v0 = vld [vmem:[%s1382_s2] sm:$0xff]   ;;  %974 = vmatprep.subr.bf16.mxu1 %v1096_v1  ;;  %978 = vmatprep.mubr.msk.bf16.mxu1 %vm1097_vm0, %v1096_v1  ;;  %v1055_v2 = vld [vmem:[%s1382_s2 + $0x8] sm:$0xff]   ;;  %v160_v13 = vlaneseq  ;;  %v1099_v24 = vmov 0.5   ;;  %v1060_v60 = vld [vmem:[%s1383_s0 + $0x10] sm:$0xff]  }
   0x2   :  { %1052 = vset.pattern.permute.xlu0 %v1098_v3  ;;  %1053 = vset.pattern.permute.xlu1 %v1098_v3  ;;  %v1056_v4 = vld [vmem:[%s1383_s0] sm:$0xff]   ;;  %v1057_v5 = vld [vmem:[%s1383_s0 + $0x8] sm:$0xff]   ;;  %v1061_v61 = vld [vmem:[%s1383_s0 + $0x18] sm:$0xff]  }
   0x3   :  { %962 = vmatprep.subr.bf16.mxu0 %v1054_v0  ;;  %966 = vmatprep.mubr.msk.bf16.mxu0 %vm71_vm1, %v1056_v4  ;;  %v1163_v6 = vld [vmem:[%s1384_s3] sm:$0xff]   ;;  %v1168_v7 = vld [vmem:[%s1384_s3 + $0x8] sm:$0xff]   ;;  %v161_v19 = vand.u32 127, %v160_v13 }
   0x4   :  { %963 = vmatpush3.bf16.msra.mxu0 %v1054_v0  ;;  %975 = vmatpush3.bf16.msra.mxu1 %v1163_v6  ;;  %v1190_v20 = vld [vmem:[%s1385_s4] ss:$0 sm:$0xff]  ;;  %s1100_s4 = smov 64  }
   0x5   :  { %964 = vmatprep.subr.bf16.mxu0 %v1055_v2  ;;  %976 = vmatprep.subr.bf16.mxu1 %v1096_v1  ;;  %vm162_vm2 = vcmp.ge.s32.totalorder %v161_v19, 64  ;;  %vm163_vm3 = vcmp.lt.s32.totalorder %v161_v19, 96 }
   0x6   :  { %vm164_vm4 = vmand %vm162_vm2, %vm163_vm3 }
   0x7   :  { %v1196_v25 = vsel %vm164_vm4, 1.0, %v1099_v24  ;;  %v1199_v29 = vsel %vm164_vm4, 0.0, %v1099_v24 }
   0x8   :  { %965 = vmatpush3.bf16.msra.mxu0 %v1055_v2  ;;  %977 = vmatpush3.bf16.msra.mxu1 %v1168_v7 }
   0x9   :  { %990 = vmatprep.subr.bf16.mxu0 %v1096_v1  ;;  %982 = vmatprep.subr.bf16.mxu1 %v1096_v1 }
   0xb   :  { %967 = vmatmul.mubr.msk.bf16.vlgmr.msra.gmra.mrb[0].mxu0 %vm71_vm1, %v1057_v5  ;;  %979 = vmatmul.mubr.bf16.vlgmr.msra.gmra.mrb[0].mxu1 %v1098_v3 }
   0xc   :  { %991 = vmatpush3.bf16.msra.mxu0 %v1163_v6  ;;  %983 = vmatpush3.bf16.msra.mxu1 %v1163_v6 }
   0xd   :  { %992 = vmatprep.subr.bf16.mxu0 %v1096_v1  ;;  %986 = vmatprep.mubr.msk.bf16.mxu1 %vm1097_vm0, %v1096_v1 }
   0xe   :  { %984 = vmatprep.subr.bf16.mxu1 %v1096_v1  ;;  %970 = vmatprep.mubr.msk.bf16.mxu0 %vm71_vm1, %v1060_v60 }
  0x10   :  { %993 = vmatpush3.bf16.msra.mxu0 %v1168_v7  ;;  %985 = vmatpush3.bf16.msra.mxu1 %v1168_v7 }
  0x11   :  { %1006 = vmatprep.subr.bf16.mxu0 %v1096_v1  ;;  %998 = vmatprep.subr.bf16.mxu1 %v1096_v1 }
  0x13   :  { %971 = vmatmul.mubr.msk.bf16.gmra.mrb[4].mxu0 %vm71_vm1, %v1061_v61 }
  0x14   :  { %994 = vmatprep.mubr.msk.bf16.mxu0 %vm1097_vm0, %v1096_v1 }
  0xde   :  { %v968_v8 = vpop.f32.mrb[0].mxu0  ;;  %v229_v14 = vpop.f32.mrb[0].mxu1 }
  0xdf   :  { %v118_v9 = vpop.f32.mrb[1].mxu0  ;;  %v980_v16 = vpop.f32.mrb[1].mxu1 }
  0xe0   :  { %v969_v10 = vpop.f32.mrb[2].mxu0  ;;  %v232_v17 = vpop.f32.mrb[2].mxu1 }
  0xe1   :  { %v150_v11 = vpack.c.bf16 %v969_v10, %v968_v8  ;;  %v121_v12 = vpop.f32.mrb[3].mxu0  ;;  %v981_v18 = vpop.f32.mrb[3].mxu1 }
  0xe2   :  { %v149_v15 = vpack.c.bf16 %v121_v12, %v118_v9 }
  0xe3   :  { %154 = vst [vmem:[#allocation2 + $0x8] sm:$0xff] %v150_v11 }
  0xe4   :  { %153 = vst [vmem:[#allocation2] sm:$0xff] %v149_v15 }
  0xe6   :  { %v972_v4 = vpop.f32.mrb[4].mxu0 }
  0xe7   :  { %v134_v5 = vpop.f32.mrb[5].mxu0 }
  0xe8   :  { %v973_v8 = vpop.f32.mrb[6].mxu0 }
  0xe9   :  { %v152_v9 = vpack.c.bf16 %v973_v8, %v972_v4  ;;  %v137_v10 = vpop.f32.mrb[7].mxu0 }
  0xea   :  { %v151_v11 = vpack.c.bf16 %v137_v10, %v134_v5 }
  0xeb   :  { %v1192_v21 = vld [vmem:[#allocation2] ss:$8 sps:$4 sm:$0xff]   ;;  %v264_v42 = vld [vmem:[#allocation2] sm:$0xf0]  ;;  %156 = vst [vmem:[#allocation2 + $0x18] sm:$0xff] %v152_v9 }
  0xec   :  { %v168_v22 = vunpack.c.l.bf16 %v1192_v21  ;;  %v266_v43 = vrot.slane %v264_v42, 4  ;;  %155 = vst [vmem:[#allocation2 + $0x10] sm:$0xff] %v151_v11  ;;  %v347_v13 = vunpack.c.h.bf16 %v1192_v21 }
  0xee   :  { %v175_v23 = vadd.f32 %v1190_v20, %v168_v22  ;;  %v268_v44 = vunpack.c.l.bf16 %v266_v43 }
  0xf0   :  { %v235_v26 = vadd.f32 %v229_v14, %v175_v23  ;;  %v269_v45 = vadd.f32 %v1190_v20, %v268_v44  ;;  %v348_v14 = vadd.f32 %v1190_v20, %v347_v13 }
  0xf2   :  { %v236_v27 = vmul.f32 %v235_v26, %v1196_v25 }
  0xf3   :  { %v1286_v61 = vld [vmem:[#allocation2 + $0x10] ss:$8 sps:$4 sm:$0xff]  }
  0xf4   :  { %1064 = vtanh.f32 %v236_v27 }
  0xfe   :  { %v1065_v28 = vpop.eup %1064 }
  0xff   :  { %v238_v30 = vmul.f32 %v1065_v28, %v1196_v25 }
 0x101   :  { %v239_v31 = vadd.f32 %v238_v30, %v1199_v29 }
 0x103   :  { %242 = vrot.lane.b32.xlu0 %v239_v31, %s1100_s4  ;;  %v240_v34 = vmul.f32 0.0, %v239_v31 }
 0x175   :  { %v243_v32 = vpop.permute.xlu0 %242 }
 0x176   :  { %v245_v33 = vmul.f32 %v243_v32, %v239_v31 }
 0x178   :  { %247 = vrot.lane.b32.xlu0 %v245_v33, %s1101_s13 }
 0x1ea   :  { %v248_v35 = vpop.permute.xlu0 %247 }
 0x1eb   :  { %v250_v36 = vadd.f32 %v248_v35, %v240_v34 }
 0x1ed   :  { %1066 = vtanh.f32 %v250_v36 }
 0x1f7   :  { %v1067_v37 = vpop.eup %1066 }
 0x1f8   :  { %253 = vrot.lane.b32.xlu1 %v1067_v37, %s1100_s4  ;;  %v425_v37 = vld [vmem:[#allocation2 + $0x8] sm:$0xf0] }
 0x26a   :  { %v254_v38 = vpop.permute.xlu1 %253 }
 0x26b   :  { %v1206_v39 = vmul.f32 %v254_v38, %v239_v31  ;;  %v427_v38 = vrot.slane %v425_v37, 4 }
 0x26d   :  { %v270_v40 = vpack.c.bf16 %v1206_v39, %v1206_v39 }
 0x26f   :  { %272 = vrot.lane.b32.xlu1 %v270_v40, %s1101_s13  ;;  %v429_v40 = vunpack.c.l.bf16 %v427_v38 }
 0x2e1   :  { %v273_v41 = vpop.permute.xlu1 %272 }
 0x2e2   :  { %987 = vmatmul.mubr.msk.bf16.vlgmr.msra.gmra.mrb[4].mxu1 %vm71_vm1, %v273_v41  ;;  %v430_v41 = vadd.f32 %v1190_v20, %v429_v40 }
 0x2e3   :  { %999 = vmatpush3.bf16.msra.mxu1 %v1163_v6  ;;  %1002 = vmatprep.mubr.msk.bf16.mxu1 %vm1097_vm0, %v1096_v1 }
 0x2e4   :  { %1000 = vmatprep.subr.bf16.mxu1 %v1096_v1 }
 0x2e7   :  { %1001 = vmatpush3.bf16.msra.mxu1 %v1168_v7 }
 0x2e8   :  { %1014 = vmatprep.subr.bf16.mxu1 %v1096_v1 }
 0x3b5   :  { %v311_v46 = vpop.f32.mrb[4].mxu1 }
 0x3b6   :  { %v317_v47 = vadd.f32 %v311_v46, %v269_v45  ;;  %v988_v48 = vpop.f32.mrb[5].mxu1 }
 0x3b7   :  { %v314_v49 = vpop.f32.mrb[6].mxu1 }
 0x3b8   :  { %v318_v50 = vmul.f32 %v317_v47, %v1196_v25  ;;  %v989_v51 = vpop.f32.mrb[7].mxu1 }
 0x3ba   :  { %1068 = vtanh.f32 %v318_v50 }
 0x3c4   :  { %v1069_v52 = vpop.eup %1068 }
 0x3c5   :  { %v320_v53 = vmul.f32 %v1069_v52, %v1196_v25 }
 0x3c7   :  { %v321_v54 = vadd.f32 %v320_v53, %v1199_v29 }
 0x3c9   :  { %324 = vrot.lane.b32.xlu0 %v321_v54, %s1100_s4  ;;  %v322_v57 = vmul.f32 %v321_v54, %v250_v36 }
 0x43b   :  { %v325_v55 = vpop.permute.xlu0 %324 }
 0x43c   :  { %v327_v56 = vmul.f32 %v325_v55, %v321_v54 }
 0x43e   :  { %329 = vrot.lane.b32.xlu1 %v327_v56, %s1101_s13 }
 0x4b0   :  { %v330_v58 = vpop.permute.xlu1 %329 }
 0x4b1   :  { %v332_v59 = vadd.f32 %v330_v58, %v322_v57 }
 0x4b3   :  { %1070 = vtanh.f32 %v332_v59 }
 0x4bd   :  { %v1071_v62 = vpop.eup %1070 }
 0x4be   :  { %335 = vrot.lane.b32.xlu0 %v1071_v62, %s1100_s4  ;;  %v508_v62 = vunpack.c.l.bf16 %v1286_v61 }
 0x530   :  { %v336_v63 = vpop.permute.xlu0 %335 }
 0x531   :  { %v1235_v0 = vmul.f32 %v336_v63, %v321_v54  ;;  %v509_v63 = vadd.f32 %v1190_v20, %v508_v62 }
 0x533   :  { %v349_v2 = vpack.c.bf16 %v1235_v0, %v1235_v0 }
 0x535   :  { %351 = vrot.lane.b32.xlu1 %v349_v2, %s1101_s13 }
 0x5a7   :  { %v352_v12 = vpop.permute.xlu1 %351 }
 0x5a8   :  { %995 = vmatmul.mubr.msk.bf16.vlgmr.msra.gmra.mrb[8].mxu0 %vm71_vm1, %v352_v12 }
 0x5a9   :  { %1007 = vmatpush3.bf16.msra.mxu0 %v1163_v6  ;;  %1010 = vmatprep.mubr.msk.bf16.mxu0 %vm1097_vm0, %v1096_v1 }
 0x5aa   :  { %1008 = vmatprep.subr.bf16.mxu0 %v1096_v1 }
 0x5ad   :  { %1009 = vmatpush3.bf16.msra.mxu0 %v1168_v7 }
 0x5ae   :  { %1022 = vmatprep.subr.bf16.mxu0 %v1096_v1 }
 0x67b   :  { %v390_v15 = vpop.f32.mrb[8].mxu0 }
 0x67c   :  { %v396_v16 = vadd.f32 %v390_v15, %v348_v14  ;;  %v996_v17 = vpop.f32.mrb[9].mxu0 }
 0x67d   :  { %v393_v18 = vpop.f32.mrb[10].mxu0 }
 0x67e   :  { %v397_v19 = vmul.f32 %v396_v16, %v1196_v25  ;;  %v997_v22 = vpop.f32.mrb[11].mxu0 }
 0x680   :  { %1072 = vtanh.f32 %v397_v19 }
 0x68a   :  { %v1073_v23 = vpop.eup %1072 }
 0x68b   :  { %v399_v24 = vmul.f32 %v1073_v23, %v1196_v25 }
 0x68d   :  { %v400_v26 = vadd.f32 %v399_v24, %v1199_v29 }
 0x68f   :  { %403 = vrot.lane.b32.xlu0 %v400_v26, %s1100_s4  ;;  %v401_v21 = vmul.f32 %v400_v26, %v332_v59 }
 0x701   :  { %v404_v27 = vpop.permute.xlu0 %403 }
 0x702   :  { %v406_v28 = vmul.f32 %v404_v27, %v400_v26  ;;  %v586_v27 = vld [vmem:[#allocation2 + $0x10] sm:$0xf0] }
 0x704   :  { %408 = vrot.lane.b32.xlu1 %v406_v28, %s1101_s13  ;;  %v588_v28 = vrot.slane %v586_v27, 4  ;;  %v157_v27 = vld [vmem:[%s1386_s1] sm:$0xff] }
 0x776   :  { %v409_v30 = vpop.permute.xlu1 %408 }
 0x777   :  { %v411_v31 = vadd.f32 %v409_v30, %v401_v21  ;;  %v590_v21 = vunpack.c.l.bf16 %v588_v28  ;;  %v914_v28 = vadd.s32 4294967295, %v157_v27 }
 0x779   :  { %1074 = vtanh.f32 %v411_v31  ;;  %v591_v30 = vadd.f32 %v1190_v20, %v590_v21  ;;  %vm257_vm5 = vcmp.eq.s32.totalorder %v914_v28, 0  ;;  %vm500_vm6 = vcmp.eq.s32.totalorder %v914_v28, 3 }
 0x77a   :  { %vm661_vm7 = vcmp.eq.s32.totalorder %v914_v28, 5  ;;  %vm822_vm8 = vcmp.eq.s32.totalorder %v914_v28, 7  ;;  %vm339_vm9 = vcmp.eq.s32.totalorder %v914_v28, 1  ;;  %vm418_vm10 = vcmp.eq.s32.totalorder %v914_v28, 2 }
 0x77b   :  { %vm579_vm11 = vcmp.eq.s32.totalorder %v914_v28, 4  ;;  %vm740_vm12 = vcmp.eq.s32.totalorder %v914_v28, 6 }
 0x783   :  { %v1075_v32 = vpop.eup %1074 }
 0x784   :  { %414 = vrot.lane.b32.xlu0 %v1075_v32, %s1100_s4 }
 0x7f6   :  { %v415_v33 = vpop.permute.xlu0 %414 }
 0x7f7   :  { %v1255_v34 = vmul.f32 %v415_v33, %v400_v26 }
 0x7f9   :  { %v431_v35 = vpack.c.bf16 %v1255_v34, %v1255_v34 }
 0x7fb   :  { %433 = vrot.lane.b32.xlu1 %v431_v35, %s1101_s13 }
 0x86d   :  { %v434_v36 = vpop.permute.xlu1 %433 }
 0x86e   :  { %1003 = vmatmul.mubr.msk.bf16.vlgmr.msra.gmra.mrb[8].mxu1 %vm71_vm1, %v434_v36 }
 0x86f   :  { %1015 = vmatpush3.bf16.msra.mxu1 %v1163_v6  ;;  %1018 = vmatprep.mubr.msk.bf16.mxu1 %vm1097_vm0, %v1096_v1 }
 0x870   :  { %1016 = vmatprep.subr.bf16.mxu1 %v1096_v1 }
 0x873   :  { %1017 = vmatpush3.bf16.msra.mxu1 %v1168_v7 }
 0x874   :  { %1030 = vmatprep.subr.bf16.mxu1 %v1096_v1 }
 0x941   :  { %v472_v42 = vpop.f32.mrb[8].mxu1 }
 0x942   :  { %v478_v43 = vadd.f32 %v472_v42, %v430_v41  ;;  %v1004_v44 = vpop.f32.mrb[9].mxu1 }
 0x943   :  { %v475_v45 = vpop.f32.mrb[10].mxu1 }
 0x944   :  { %v479_v46 = vmul.f32 %v478_v43, %v1196_v25  ;;  %v1005_v47 = vpop.f32.mrb[11].mxu1 }
 0x946   :  { %1076 = vtanh.f32 %v479_v46 }
 0x950   :  { %v1077_v48 = vpop.eup %1076 }
 0x951   :  { %v481_v49 = vmul.f32 %v1077_v48, %v1196_v25 }
 0x953   :  { %v482_v50 = vadd.f32 %v481_v49, %v1199_v29 }
 0x955   :  { %485 = vrot.lane.b32.xlu0 %v482_v50, %s1100_s4  ;;  %v483_v53 = vmul.f32 %v482_v50, %v411_v31 }
 0x9c7   :  { %v486_v51 = vpop.permute.xlu0 %485 }
 0x9c8   :  { %v488_v52 = vmul.f32 %v486_v51, %v482_v50 }
 0x9ca   :  { %490 = vrot.lane.b32.xlu1 %v488_v52, %s1101_s13 }
 0xa3c   :  { %v491_v54 = vpop.permute.xlu1 %490 }
 0xa3d   :  { %v493_v55 = vadd.f32 %v491_v54, %v483_v53 }
 0xa3f   :  { %1078 = vtanh.f32 %v493_v55 }
 0xa49   :  { %v1079_v56 = vpop.eup %1078 }
 0xa4a   :  { %496 = vrot.lane.b32.xlu0 %v1079_v56, %s1100_s4 }
 0xabc   :  { %v497_v57 = vpop.permute.xlu0 %496 }
 0xabd   :  { %v1274_v58 = vmul.f32 %v497_v57, %v482_v50  ;;  %v669_v50 = vunpack.c.h.bf16 %v1286_v61 }
 0xabf   :  { %v510_v59 = vpack.c.bf16 %v1274_v58, %v1274_v58  ;;  %v670_v51 = vadd.f32 %v1190_v20, %v669_v50 }
 0xac1   :  { %512 = vrot.lane.b32.xlu1 %v510_v59, %s1101_s13 }
 0xb33   :  { %v513_v60 = vpop.permute.xlu1 %512 }
 0xb34   :  { %1011 = vmatmul.mubr.msk.bf16.vlgmr.msra.gmra.mrb[12].mxu0 %vm71_vm1, %v513_v60 }
 0xb35   :  { %1023 = vmatpush3.bf16.msra.mxu0 %v1163_v6  ;;  %1026 = vmatprep.mubr.msk.bf16.mxu0 %vm1097_vm0, %v1096_v1 }
 0xb36   :  { %1024 = vmatprep.subr.bf16.mxu0 %v1096_v1 }
 0xb39   :  { %1025 = vmatpush3.bf16.msra.mxu0 %v1168_v7 }
 0xb3a   :  { %1038 = vmatprep.subr.bf16.mxu0 %v1096_v1 }
 0xc07   :  { %v551_v2 = vpop.f32.mrb[12].mxu0 }
 0xc08   :  { %v557_v4 = vadd.f32 %v551_v2, %v509_v63  ;;  %v1012_v5 = vpop.f32.mrb[13].mxu0 }
 0xc09   :  { %v554_v8 = vpop.f32.mrb[14].mxu0 }
 0xc0a   :  { %v558_v9 = vmul.f32 %v557_v4, %v1196_v25  ;;  %v1013_v10 = vpop.f32.mrb[15].mxu0 }
 0xc0c   :  { %1080 = vtanh.f32 %v558_v9 }
 0xc16   :  { %v1081_v11 = vpop.eup %1080 }
 0xc17   :  { %v560_v12 = vmul.f32 %v1081_v11, %v1196_v25 }
 0xc19   :  { %v561_v13 = vadd.f32 %v560_v12, %v1199_v29 }
 0xc1b   :  { %564 = vrot.lane.b32.xlu0 %v561_v13, %s1100_s4  ;;  %v562_v16 = vmul.f32 %v561_v13, %v493_v55 }
 0xc8d   :  { %v565_v14 = vpop.permute.xlu0 %564 }
 0xc8e   :  { %v567_v15 = vmul.f32 %v565_v14, %v561_v13 }
 0xc90   :  { %569 = vrot.lane.b32.xlu1 %v567_v15, %s1101_s13 }
 0xd02   :  { %v570_v17 = vpop.permute.xlu1 %569 }
 0xd03   :  { %v572_v18 = vadd.f32 %v570_v17, %v562_v16 }
 0xd05   :  { %1082 = vtanh.f32 %v572_v18 }
 0xd0f   :  { %v1083_v19 = vpop.eup %1082 }
 0xd10   :  { %575 = vrot.lane.b32.xlu0 %v1083_v19, %s1100_s4 }
 0xd82   :  { %v576_v22 = vpop.permute.xlu0 %575 }
 0xd83   :  { %v1296_v23 = vmul.f32 %v576_v22, %v561_v13  ;;  %v747_v13 = vld [vmem:[#allocation2 + $0x18] sm:$0xf0] }
 0xd84   :  { %v749_v14 = vrot.slane %v747_v13, 4 }
 0xd85   :  { %v592_v24 = vpack.c.bf16 %v1296_v23, %v1296_v23 }
 0xd86   :  { %v751_v15 = vunpack.c.l.bf16 %v749_v14 }
 0xd87   :  { %594 = vrot.lane.b32.xlu1 %v592_v24, %s1101_s13 }
 0xd88   :  { %v752_v16 = vadd.f32 %v1190_v20, %v751_v15  ;;  %v258_v20 = vsel %vm257_vm5, 1, %v1098_v3 }
 0xdf9   :  { %v595_v26 = vpop.permute.xlu1 %594 }
 0xdfa   :  { %1019 = vmatmul.mubr.msk.bf16.vlgmr.msra.gmra.mrb[12].mxu1 %vm71_vm1, %v595_v26 }
 0xdfb   :  { %1031 = vmatpush3.bf16.msra.mxu1 %v1163_v6  ;;  %1034 = vmatprep.mubr.msk.bf16.mxu1 %vm1097_vm0, %v1096_v1 }
 0xdfc   :  { %1032 = vmatprep.subr.bf16.mxu1 %v1096_v1 }
 0xdff   :  { %1033 = vmatpush3.bf16.msra.mxu1 %v1168_v7 }
 0xecd   :  { %v633_v31 = vpop.f32.mrb[12].mxu1 }
 0xece   :  { %v639_v32 = vadd.f32 %v633_v31, %v591_v30  ;;  %v1020_v33 = vpop.f32.mrb[13].mxu1 }
 0xecf   :  { %v636_v35 = vpop.f32.mrb[14].mxu1  ;;  %v662_v33 = vsel %vm661_vm7, 1, %v1098_v3 }
 0xed0   :  { %v640_v36 = vmul.f32 %v639_v32, %v1196_v25  ;;  %v1021_v37 = vpop.f32.mrb[15].mxu1  ;;  %v501_v32 = vsel %vm500_vm6, 1, %v1098_v3 }
 0xed1   :  { %v419_v37 = vsel %vm418_vm10, 1, %v1098_v3 }
 0xed2   :  { %1084 = vtanh.f32 %v640_v36  ;;  %v340_v36 = vsel %vm339_vm9, 1, %v1098_v3 }
 0xedc   :  { %v1085_v6 = vpop.eup %1084 }
 0xedd   :  { %v642_v38 = vmul.f32 %v1085_v6, %v1196_v25  ;;  %v580_v6 = vsel %vm579_vm11, 1, %v1098_v3 }
 0xedf   :  { %v643_v40 = vadd.f32 %v642_v38, %v1199_v29  ;;  %v741_v38 = vsel %vm740_vm12, 1, %v1098_v3 }
 0xee1   :  { %646 = vrot.lane.b32.xlu0 %v643_v40, %s1100_s4  ;;  %v644_v42 = vmul.f32 %v643_v40, %v572_v18 }
 0xf53   :  { %v647_v7 = vpop.permute.xlu0 %646 }
 0xf54   :  { %v649_v41 = vmul.f32 %v647_v7, %v643_v40 }
 0xf56   :  { %651 = vrot.lane.b32.xlu1 %v649_v41, %s1101_s13 }
 0xfc8   :  { %v652_v43 = vpop.permute.xlu1 %651 }
 0xfc9   :  { %v654_v44 = vadd.f32 %v652_v43, %v644_v42  ;;  %v1062_v42 = vld [vmem:[%s1387_s5] sm:$0xff]   ;;  %v1063_v43 = vld [vmem:[%s1387_s5 + $0x8] sm:$0xff]  }
 0xfcb   :  { %1086 = vtanh.f32 %v654_v44 }
 0xfd5   :  { %v1087_v45 = vpop.eup %1086 }
 0xfd6   :  { %657 = vrot.lane.b32.xlu0 %v1087_v45, %s1100_s4 }
0x1048   :  { %v658_v46 = vpop.permute.xlu0 %657 }
0x1049   :  { %v1314_v47 = vmul.f32 %v658_v46, %v643_v40 }
0x104b   :  { %v671_v48 = vpack.c.bf16 %v1314_v47, %v1314_v47 }
0x104d   :  { %673 = vrot.lane.b32.xlu1 %v671_v48, %s1101_s13 }
0x10bf   :  { %v674_v49 = vpop.permute.xlu1 %673 }
0x10c0   :  { %1027 = vmatmul.mubr.msk.bf16.vlgmr.msra.gmra.mrb[16].mxu0 %vm71_vm1, %v674_v49 }
0x10c1   :  { %1042 = vmatprep.mubr.msk.bf16.mxu0 %vm1097_vm0, %v1096_v1  ;;  %1039 = vmatpush3.bf16.msra.mxu0 %v1062_v42 }
0x10c2   :  { %1040 = vmatprep.subr.bf16.mxu0 %v1096_v1 }
0x10c5   :  { %1041 = vmatpush3.bf16.msra.mxu0 %v1063_v43 }
0x1193   :  { %v712_v52 = vpop.f32.mrb[16].mxu0 }
0x1194   :  { %v718_v53 = vadd.f32 %v712_v52, %v670_v51  ;;  %v1028_v54 = vpop.f32.mrb[17].mxu0 }
0x1195   :  { %v715_v55 = vpop.f32.mrb[18].mxu0 }
0x1196   :  { %v719_v56 = vmul.f32 %v718_v53, %v1196_v25  ;;  %v1029_v57 = vpop.f32.mrb[19].mxu0 }
0x1198   :  { %1088 = vtanh.f32 %v719_v56 }
0x11a2   :  { %v1089_v59 = vpop.eup %1088 }
0x11a3   :  { %v721_v60 = vmul.f32 %v1089_v59, %v1196_v25 }
0x11a5   :  { %v722_v62 = vadd.f32 %v721_v60, %v1199_v29 }
0x11a7   :  { %725 = vrot.lane.b32.xlu0 %v722_v62, %s1100_s4  ;;  %v723_v61 = vmul.f32 %v722_v62, %v654_v44 }
0x1219   :  { %v726_v63 = vpop.permute.xlu0 %725 }
0x121a   :  { %v728_v2 = vmul.f32 %v726_v63, %v722_v62 }
0x121c   :  { %730 = vrot.lane.b32.xlu1 %v728_v2, %s1101_s13 }
0x128e   :  { %v731_v4 = vpop.permute.xlu1 %730 }
0x128f   :  { %v733_v5 = vadd.f32 %v731_v4, %v723_v61 }
0x1291   :  { %1090 = vtanh.f32 %v733_v5 }
0x129b   :  { %v1091_v8 = vpop.eup %1090 }
0x129c   :  { %736 = vrot.lane.b32.xlu0 %v1091_v8, %s1100_s4 }
0x130e   :  { %v737_v9 = vpop.permute.xlu0 %736 }
0x130f   :  { %v1330_v10 = vmul.f32 %v737_v9, %v722_v62 }
0x1311   :  { %v753_v11 = vpack.c.bf16 %v1330_v10, %v1330_v10 }
0x1313   :  { %755 = vrot.lane.b32.xlu1 %v753_v11, %s1101_s13 }
0x1385   :  { %v756_v12 = vpop.permute.xlu1 %755 }
0x1386   :  { %1035 = vmatmul.mubr.msk.bf16.vlgmr.msra.gmra.mrb[16].mxu1 %vm71_vm1, %v756_v12 }
0x1459   :  { %v794_v17 = vpop.f32.mrb[16].mxu1 }
0x145a   :  { %v800_v18 = vadd.f32 %v794_v17, %v752_v16  ;;  %v1036_v19 = vpop.f32.mrb[17].mxu1 }
0x145b   :  { %v797_v22 = vpop.f32.mrb[18].mxu1 }
0x145c   :  { %v801_v24 = vmul.f32 %v800_v18, %v1196_v25  ;;  %v1037_v26 = vpop.f32.mrb[19].mxu1 }
0x145e   :  { %1092 = vtanh.f32 %v801_v24 }
0x1468   :  { %v1093_v21 = vpop.eup %1092 }
0x1469   :  { %v803_v30 = vmul.f32 %v1093_v21, %v1196_v25  ;;  %v823_v25 = vsel %vm822_vm8, 1, %v1098_v3 }
0x146b   :  { %v1343_v31 = vadd.f32 %v803_v30, %v1199_v29 }
0x146d   :  { %807 = vrot.lane.b32.xlu0 %v1343_v31, %s1100_s4  ;;  %v805_v40 = vmul.f32 %v1343_v31, %v733_v5 }
0x1471   :  { %260 = vperm.xlu0 %1052, %v258_v20  }
0x1475   :  { %503 = vperm.xlu0 %1052, %v501_v32  }
0x1479   :  { %664 = vperm.xlu0 %1052, %v662_v33  }
0x147d   :  { %825 = vperm.xlu0 %1052, %v823_v25  }
0x14df   :  { %v808_v29 = vpop.permute.xlu0 %807 }
0x14e0   :  { %v810_v35 = vmul.f32 %v808_v29, %v1343_v31 }
0x14e2   :  { %812 = vrot.lane.b32.xlu1 %v810_v35, %s1101_s13 }
0x14e6   :  { %342 = vperm.xlu1 %1053, %v340_v36  }
0x14ea   :  { %421 = vperm.xlu1 %1053, %v419_v37  }
0x14ee   :  { %582 = vperm.xlu1 %1053, %v580_v6  }
0x14f0   :  { %v261_v46 = vpop.permute.xlu0 %260 }
0x14f1   :  { %vm262_vm13 = vcmp.eq.s32.totalorder %v261_v46, 1 }
0x14f2   :  { %743 = vperm.xlu1 %1053, %v741_v38   ;;  %v263_v50 = vsel %vm262_vm13, %v1206_v39, 0.0 }
0x14f4   :  { %v504_v48 = vpop.permute.xlu0 %503 }
0x14f5   :  { %vm505_vm0 = vcmp.eq.s32.totalorder %v504_v48, 1 }
0x14f8   :  { %v665_v1 = vpop.permute.xlu0 %664 }
0x14f9   :  { %vm666_vm3 = vcmp.eq.s32.totalorder %v665_v1, 1 }
0x14fc   :  { %v826_v56 = vpop.permute.xlu0 %825 }
0x14fd   :  { %vm827_vm5 = vcmp.eq.s32.totalorder %v826_v56, 1 }
0x1554   :  { %v813_v7 = vpop.permute.xlu1 %812 }
0x1555   :  { %v815_v41 = vadd.f32 %v813_v7, %v805_v40 }
0x1557   :  { %1094 = vtanh.f32 %v815_v41 }
0x1561   :  { %v1095_v44 = vpop.eup %1094 }
0x1562   :  { %818 = vrot.lane.b32.xlu1 %v1095_v44, %s1100_s4 }
0x1565   :  { %v343_v3 = vpop.permute.xlu1 %342 }
0x1566   :  { %vm344_vm14 = vcmp.eq.s32.totalorder %v343_v3, 1 }
0x1567   :  { %v345_v51 = vsel %vm344_vm14, %v1235_v0, %v263_v50 }
0x1569   :  { %v422_v45 = vpop.permute.xlu1 %421 }
0x156a   :  { %vm423_vm15 = vcmp.eq.s32.totalorder %v422_v45, 1 }
0x156b   :  { %v424_v52 = vsel %vm423_vm15, %v1255_v34, %v345_v51 }
0x156c   :  { %v506_v54 = vsel %vm505_vm0, %v1274_v58, %v424_v52  ;;  %v925_v58 = vld [vmem:[%s1388_s6] ss:$0 sm:$0xff] }
0x156d   :  { %v583_v49 = vpop.permute.xlu1 %582 }
0x156e   :  { %vm584_vm2 = vcmp.eq.s32.totalorder %v583_v49, 1 }
0x156f   :  { %v585_v55 = vsel %vm584_vm2, %v1296_v23, %v506_v54 }
0x1570   :  { %v667_v59 = vsel %vm666_vm3, %v1314_v47, %v585_v55 }
0x1571   :  { %v744_v53 = vpop.permute.xlu1 %743 }
0x1572   :  { %vm745_vm4 = vcmp.eq.s32.totalorder %v744_v53, 1 }
0x1573   :  { %v746_v0 = vsel %vm745_vm4, %v1330_v10, %v667_v59 }
0x15d4   :  { %v819_v57 = vpop.permute.xlu1 %818 }
0x15d5   :  { %v821_v39 = vmul.f32 %v819_v57, %v1343_v31 }
0x15d7   :  { %v828_v34 = vsel %vm827_vm5, %v821_v39, %v746_v0 }
0x15d8   :  { %v829_v60 = vpack.c.bf16 %v828_v34, %v828_v34 }
0x15da   :  { %842 = vrot.lane.b32.xlu0 %v829_v60, %s1101_s13 }
0x164c   :  { %v843_v62 = vpop.permute.xlu0 %842 }
0x164d   :  { %1043 = vmatmul.mubr.msk.bf16.vlgmr.msra.gmra.mrb[20].mxu0 %vm71_vm1, %v843_v62 }
0x1720   :  { %v893_v23 = vpop.f32.mrb[20].mxu0 }
0x1721   :  { %v894_v63 = vadd.f32 %v925_v58, %v893_v23  ;;  %v1044_v2 = vpop.f32.mrb[21].mxu0 }
0x1722   :  { %v896_v47 = vpop.f32.mrb[22].mxu0 }
0x1723   :  { %899 = vst [vmem:[%s1389_s7] sm:$0xff] %v894_v63  ;;  %v1045_v61 = vpop.f32.mrb[23].mxu0 }

</bundles_post_ra>
